<compile_context>
chip_gen: v6e
topology: v6e:2x2x1
jax: 0.10.0
libtpu: 0.0.40
codegen_flags: <defaults>
</compile_context>

<pallas_src>
import jax
import jax.numpy as jnp
from jax.experimental import pallas as pl
from jax.experimental.pallas import tpu as pltpu


# ----------------------------- shared math helpers ---------------------------

def _layernorm(x, g, b, eps=1e-5):
    mu = jnp.mean(x, axis=-1, keepdims=True)
    var = jnp.mean((x - mu) ** 2, axis=-1, keepdims=True)
    return (x - mu) * jax.lax.rsqrt(var + eps) * g + b


def _gelu_new(x):
    # GPT-2 "gelu_new": 0.5*x*(1+tanh(sqrt(2/pi)*(x+0.044715*x^3)))
    c = jnp.sqrt(2.0 / jnp.pi).astype(x.dtype)
    return 0.5 * x * (1.0 + jnp.tanh(c * (x + 0.044715 * x * x * x)))


def _round_up(n, m):
    return ((n + m - 1) // m) * m


def _bf16_round(a):
    return a.astype(jnp.bfloat16).astype(jnp.float32)


# --------------------------------- kernel ------------------------------------
# pvec rows (per layer, each row 4H wide):
#   row 0: [ln1_g | ln1_b | ln2_g | ln2_b]           (H-wide chunks)
#   row 1: [att_b_fused | mproj_b | 0 | 0]
#   row 2: fc_b
#   row 3: padding
# gvec rows (global, H wide): 0 proj_b + wpe[0], 1 lnf_g, 2 lnf_b, 3 pad

def gpt2_predictor_kernel(
    x_ref,        # (TB, inp_dim)  f32
    gvec_ref,     # (4, H)         f32   (constant across grid)
    proj_w_ref,   # (inp_dim, H)   f32   (constant)
    out_w_ref,    # (H, out_pad)   f32   (constant)
    out_b_ref,    # (1, out_pad)   f32   (constant)
    pvec_ref,     # (4, 4H)        f32   (per layer)
    attw_ref,     # (H, H)         bf16  (per layer; fused Wv @ Wattn_proj)
    fc_w_ref,     # (H, 4H)        bf16  (per layer)
    mproj_w_ref,  # (4H, H)        bf16  (per layer)
    o_ref,        # (TB, out_pad)  f32
    h_ref,        # (B_pad, H)     f32   scratch: hidden state, carried across layers
):
    l = pl.program_id(0)
    H = proj_w_ref.shape[1]
    TB = x_ref.shape[0]
    row = pl.multiple_of(pl.program_id(1) * TB, 8)   # this batch tile's rows
    bf16 = jnp.bfloat16

    # --- input projection + position-0 embedding (only at the first layer) ---
    @pl.when(l == 0)
    def _():
        h0 = jnp.dot(x_ref[...], proj_w_ref[...],
                     preferred_element_type=jnp.float32)
        h_ref[pl.ds(row, TB), :] = h0 + gvec_ref[0:1, :]   # proj_b + wpe0

    h = h_ref[pl.ds(row, TB), :]

    # --- attention (seq_len == 1: softmax over one key == 1 -> context == V) ---
    #     h += LN1(h) @ (Wv @ Wproj) + b_att        (fused on the host)
    a_in = _layernorm(h, pvec_ref[0:1, 0:H], pvec_ref[0:1, H:2 * H])
    h = h + (jnp.dot(a_in.astype(bf16), attw_ref[...],
                     preferred_element_type=jnp.float32) + pvec_ref[1:2, 0:H])

    # --- MLP: h += gelu_new(LN2(h) @ fc_w + fc_b) @ mproj_w + mproj_b ---
    m_in = _layernorm(h, pvec_ref[0:1, 2 * H:3 * H], pvec_ref[0:1, 3 * H:4 * H])
    m = jnp.dot(m_in.astype(bf16), fc_w_ref[...],
                preferred_element_type=jnp.float32) + pvec_ref[2:3, :]
    m = _gelu_new(m)
    h = h + (jnp.dot(m.astype(bf16), mproj_w_ref[...],
                     preferred_element_type=jnp.float32) + pvec_ref[1:2, H:2 * H])
    h_ref[pl.ds(row, TB), :] = h

    # --- final LayerNorm + output head (only at the last layer) ---
    @pl.when(l == pl.num_programs(0) - 1)
    def _():
        hf = _layernorm(h, gvec_ref[1:2, :], gvec_ref[2:3, :])
        o_ref[...] = jnp.dot(hf, out_w_ref[...],
                             preferred_element_type=jnp.float32) + out_b_ref[...]


# ------------------------------ param packing --------------------------------

def pack_params(p, out_dim):
    f32 = jnp.float32
    H = p["proj_w"].shape[1]
    L = p["ln1_g"].shape[0]
    H4 = p["fc_b"].shape[1]
    out_pad = _round_up(out_dim, 128)

    # seq_len == 1 -> attention is linear: fuse Wv with the attention output
    # projection on the host.  W_att = Wv @ Wp ;  b_att = bv @ Wp + bp.
    wv = p["attn_w"][:, :, 2 * H:]                                    # (L,H,H)
    bv = p["attn_b"][:, 2 * H:]                                       # (L,H)
    att_w = jnp.einsum("lij,ljk->lik", wv, p["aproj_w"])              # (L,H,H)
    att_b = jnp.einsum("lj,ljk->lk", bv, p["aproj_w"]) + p["aproj_b"]  # (L,H)

    row0 = jnp.concatenate([p["ln1_g"], p["ln1_b"], p["ln2_g"], p["ln2_b"]], -1)
    row1 = jnp.concatenate([att_b, p["mproj_b"], jnp.zeros((L, 2 * H), f32)], -1)
    row2 = p["fc_b"]
    row3 = jnp.zeros((L, H4), f32)
    pvec = jnp.stack([row0, row1, row2, row3], axis=1)                # (L,4,4H)

    gvec = jnp.stack([p["proj_b"] + p["wpe0"], p["lnf_g"], p["lnf_b"],
                      jnp.zeros((H,), f32)], axis=0)                  # (4,H)

    out_w = jnp.zeros((H, out_pad), f32).at[:, :out_dim].set(p["out_w"])
    out_b = jnp.zeros((1, out_pad), f32).at[0, :out_dim].set(p["out_b"])

    return dict(
        gvec=gvec.astype(f32),
        pvec=pvec.astype(f32),
        proj_w=p["proj_w"].astype(f32),          # small, kept f32 (exact)
        out_w=out_w,                              # small, kept f32 (exact)
        out_b=out_b,
        att_w=att_w.astype(jnp.bfloat16),         # big per-layer weights: bf16
        fc_w=p["fc_w"].astype(jnp.bfloat16),
        mproj_w=p["mproj_w"].astype(jnp.bfloat16),
        H=H, L=L, H4=H4, out_dim=out_dim, out_pad=out_pad,
    )


# --------------------------------- wrapper -----------------------------------

def gpt2_vec_predictor(x, pk, tb_max=256):
    B, inp_dim = x.shape
    H, L, H4 = pk["H"], pk["L"], pk["H4"]
    out_dim, out_pad = pk["out_dim"], pk["out_pad"]

    # Batch tile: multiple of 8 (f32 sublane), as large as practical (it is the
    # M dim of every GEMM -> arithmetic intensity vs streamed weights).  Awkward
    # batch sizes are zero-padded instead of asserted away.
    TB = _round_up(B, 8) if B <= tb_max else tb_max
    B_pad = _round_up(B, TB)
    nb = B_pad // TB
    if B_pad != B:
        x = jnp.pad(x, ((0, B_pad - B), (0, 0)))

    const2 = lambda l, b: (0, 0)
    per_l = lambda l, b: (l, 0, 0)

    in_specs = [
        pl.BlockSpec((TB, inp_dim), lambda l, b: (b, 0)),   # x
        pl.BlockSpec((4, H), const2),                       # gvec
        pl.BlockSpec((inp_dim, H), const2),                 # proj_w  (f32)
        pl.BlockSpec((H, out_pad), const2),                 # out_w   (f32)
        pl.BlockSpec((1, out_pad), const2),                 # out_b
        pl.BlockSpec((None, 4, H4), per_l),                 # pvec    (per layer)
        pl.BlockSpec((None, H, H), per_l),                  # fused attn W (bf16)
        pl.BlockSpec((None, H, H4), per_l),                 # fc_w    (bf16)
        pl.BlockSpec((None, H4, H), per_l),                 # mproj_w (bf16)
    ]
    out_specs = pl.BlockSpec((TB, out_pad), lambda l, b: (b, 0))

    # ---- VMEM budget (generation-aware) ----
    # Per-layer streamed blocks are double-buffered; constants are resident
    # (default 2 buffers, index never changes so no re-DMA); + hidden scratch
    # + working set for (TB, 4H) intermediates.
    per_layer_bytes = 4 * H4 * 4 + (H * H + 2 * H * H4) * 2
    stream_bytes = 2 * (per_layer_bytes + (TB * inp_dim + TB * out_pad) * 4)
    const_bytes = 2 * (4 * H + inp_dim * H + H * out_pad + out_pad) * 4
    scratch_bytes = B_pad * H * 4
    work_bytes = 8 * TB * H4 * 4
    needed = stream_bytes + const_bytes + scratch_bytes + work_bytes + (8 << 20)
    try:
        vmem_cap = int(pltpu.get_tpu_info().vmem_capacity_bytes)
    except Exception:
        vmem_cap = 64 << 20        # safe fallback: fits v7x (64 MiB) and v5e/v6e
    vmem_limit = int(min(max(needed, 32 << 20), int(vmem_cap * 0.9)))

    # ---- Cost estimate reflecting actual HBM traffic under the (L, nb) grid:
    # per-layer weights stream once; x / out blocks are re-streamed iff nb > 1.
    flops = 2 * B_pad * (inp_dim * H + L * (H * H + 2 * H * H4) + H * out_pad)
    weight_bytes = (L * ((H * H + 2 * H * H4) * 2 + 4 * H4 * 4)
                    + (4 * H + inp_dim * H + H * out_pad + out_pad) * 4)
    io_mult = L if nb > 1 else 1
    bytes_accessed = weight_bytes + io_mult * B_pad * (inp_dim + out_pad) * 4
    cost = pl.CostEstimate(flops=flops, transcendentals=B_pad * L * H4,
                           bytes_accessed=bytes_accessed)

    out = pl.pallas_call(
        gpt2_predictor_kernel,
        out_shape=jax.ShapeDtypeStruct((B_pad, out_pad), jnp.float32),
        grid_spec=pltpu.PrefetchScalarGridSpec(
            num_scalar_prefetch=0,
            grid=(L, nb),                      # layer OUTER: weights stream once
            in_specs=in_specs,
            out_specs=out_specs,
            scratch_shapes=[pltpu.VMEM((B_pad, H), jnp.float32)],
        ),
        compiler_params=pltpu.CompilerParams(
            # Layer axis carries the hidden state -> arbitrary.  Batch axis is
            # also arbitrary: batch-parallel megacore would duplicate the
            # per-layer weight DMA in the weight-bandwidth-bound regime.
            dimension_semantics=("arbitrary", "arbitrary"),
            vmem_limit_bytes=vmem_limit,
        ),
        cost_estimate=cost,
    )(x, pk["gvec"], pk["proj_w"], pk["out_w"], pk["out_b"],
      pk["pvec"], pk["att_w"], pk["fc_w"], pk["mproj_w"])
    return out[:B, :out_dim]


# ------------------------- parameter init (synthetic) ------------------------

def init_params(key, inp_dim, hidden, out_dim, n_layer=4):
    ks = jax.random.split(key, 20)
    std = 0.02
    H, L = hidden, n_layer
    r = _bf16_round   # big per-layer weights are stored bf16 in the kernel
    p = {
        "proj_w":  jax.random.normal(ks[0], (inp_dim, H)) * std,
        "proj_b":  jax.random.normal(ks[1], (H,)) * std,
        "wpe0":    jax.random.normal(ks[2], (H,)) * 0.01,
        "ln1_g":   1.0 + 0.1 * jax.random.normal(ks[3], (L, H)),
        "ln1_b":   jax.random.normal(ks[4], (L, H)) * std,
        "attn_w":  r(jax.random.normal(ks[5], (L, H, 3 * H)) * std),
        "attn_b":  jax.random.normal(ks[6], (L, 3 * H)) * std,
        "aproj_w": r(jax.random.normal(ks[7], (L, H, H)) * std),
        "aproj_b": jax.random.normal(ks[8], (L, H)) * std,
        "ln2_g":   1.0 + 0.1 * jax.random.normal(ks[9], (L, H)),
        "ln2_b":   jax.random.normal(ks[10], (L, H)) * std,
        "fc_w":    r(jax.random.normal(ks[11], (L, H, 4 * H)) * std),
        "fc_b":    jax.random.normal(ks[12], (L, 4 * H)) * std,
        "mproj_w": r(jax.random.normal(ks[13], (L, 4 * H, H)) * std),
        "mproj_b": jax.random.normal(ks[14], (L, H)) * std,
        "lnf_g":   1.0 + 0.1 * jax.random.normal(ks[15], (H,)),
        "lnf_b":   jax.random.normal(ks[16], (H,)) * std,
        "out_w":   jax.random.normal(ks[17], (H, out_dim)) * std,
        "out_b":   jax.random.normal(ks[18], (out_dim,)) * std,
    }
    return {k: v.astype(jnp.float32) for k, v in p.items()}


# ------------------------------ pure-JAX reference ----------------------------
# Full GPT-2 single-token forward (explicit per-head attention, f32 throughout)
# so the kernel's seq_len==1 + fused-attention simplification is validated
# against the real math.

def reference_forward(x, p, n_head=4):
    h = x @ p["proj_w"] + p["proj_b"] + p["wpe0"]
    B, H = h.shape
    dh = H // n_head
    L = p["ln1_g"].shape[0]
    for l in range(L):
        a = _layernorm(h, p["ln1_g"][l], p["ln1_b"][l])
        qkv = a @ p["attn_w"][l] + p["attn_b"][l]
        q, k, v = jnp.split(qkv, 3, axis=-1)
        q = q.reshape(B, 1, n_head, dh).transpose(0, 2, 1, 3)
        k = k.reshape(B, 1, n_head, dh).transpose(0, 2, 1, 3)
        v = v.reshape(B, 1, n_head, dh).transpose(0, 2, 1, 3)
        att = (q @ k.transpose(0, 1, 3, 2)) * (1.0 / jnp.sqrt(jnp.float32(dh)))
        att = jax.nn.softmax(att, axis=-1)          # == 1.0 for seq_len 1
        ctx = (att @ v).transpose(0, 2, 1, 3).reshape(B, H)
        h = h + ctx @ p["aproj_w"][l] + p["aproj_b"][l]
        m = _layernorm(h, p["ln2_g"][l], p["ln2_b"][l])
        m = _gelu_new(m @ p["fc_w"][l] + p["fc_b"][l])
        h = h + m @ p["mproj_w"][l] + p["mproj_b"][l]
    h = _layernorm(h, p["lnf_g"], p["lnf_b"])
    return h @ p["out_w"] + p["out_b"]


# ----------------------------------- main -------------------------------------

if __name__ == "__main__":
    B, inp_dim, hidden, out_dim, n_layer = 2, 16, 32, 8, 4   # hidden % 4 == 0

    key = jax.random.PRNGKey(0)
    kx, kp, kx2 = jax.random.split(key, 3)
    x = jax.random.normal(kx, (B, inp_dim), dtype=jnp.float32)
    params = init_params(kp, inp_dim, hidden, out_dim, n_layer)
    packed = pack_params(params, out_dim)

    # Case 1: small batch (padded to one 8-row tile, nb == 1).
    out = jax.block_until_ready(gpt2_vec_predictor(x, packed))
    ref = reference_forward(x, params, n_head=4)
    assert out.shape == (B, out_dim)
    err = float(jnp.max(jnp.abs(out - ref)))
    assert jnp.allclose(out, ref, atol=2e-3, rtol=2e-3), f"mismatch: {err}"

    # Case 2: batch > tile (exercises padding and the (L, nb) grid with the
    # hidden-state carry across multiple batch tiles).
    B2 = 20
    x2 = jax.random.normal(kx2, (B2, inp_dim), dtype=jnp.float32)
    out2 = jax.block_until_ready(gpt2_vec_predictor(x2, packed, tb_max=8))
    ref2 = reference_forward(x2, params, n_head=4)
    assert out2.shape == (B2, out_dim)
    err2 = float(jnp.max(jnp.abs(out2 - ref2)))
    assert jnp.allclose(out2, ref2, atol=2e-3, rtol=2e-3), f"mismatch2: {err2}"

    print("KERNEL_OK")
</pallas_src>

<mosaic_0001>
module attributes {stable_mosaic.version = 11 : i64} {
  func.func @gpt2_predictor_kernel(%arg0: i32, %arg1: i32, %arg2: memref<8x16xf32, #tpu.memory_space<vmem>>, %arg3: memref<4x32xf32, #tpu.memory_space<vmem>>, %arg4: memref<16x32xf32, #tpu.memory_space<vmem>>, %arg5: memref<32x128xf32, #tpu.memory_space<vmem>>, %arg6: memref<1x128xf32, #tpu.memory_space<vmem>>, %arg7: memref<1x4x128xf32, #tpu.memory_space<vmem>>, %arg8: memref<1x32x32xbf16, #tpu.memory_space<vmem>>, %arg9: memref<1x32x128xbf16, #tpu.memory_space<vmem>>, %arg10: memref<1x128x32xbf16, #tpu.memory_space<vmem>>, %arg11: memref<8x128xf32, #tpu.memory_space<vmem>>, %arg12: memref<8x32xf32, #tpu.memory_space<vmem>>) attributes {dimension_semantics = [#tpu.dimension_semantics<arbitrary>, #tpu.dimension_semantics<arbitrary>], iteration_bounds = array<i64: 4, 1>, scalar_prefetch = 0 : i64, scratch_operands = 1 : i64, tpu.core_type = #tpu.core_type<tc>, window_params = [{transform_indices = @transform_0, window_bounds = array<i64: 8, 16>}, {pipeline_mode = #tpu.pipeline_mode<synchronous>, transform_indices = @transform_1, window_bounds = array<i64: 4, 32>}, {pipeline_mode = #tpu.pipeline_mode<synchronous>, transform_indices = @transform_2, window_bounds = array<i64: 16, 32>}, {pipeline_mode = #tpu.pipeline_mode<synchronous>, transform_indices = @transform_3, window_bounds = array<i64: 32, 128>}, {pipeline_mode = #tpu.pipeline_mode<synchronous>, transform_indices = @transform_4, window_bounds = array<i64: 1, 128>}, {transform_indices = @transform_5, window_bounds = array<i64: 1, 4, 128>}, {transform_indices = @transform_6, window_bounds = array<i64: 1, 32, 32>}, {transform_indices = @transform_7, window_bounds = array<i64: 1, 32, 128>}, {transform_indices = @transform_8, window_bounds = array<i64: 1, 128, 32>}, {transform_indices = @transform_9, window_bounds = array<i64: 8, 128>}]} {
    %c8_i32 = arith.constant 8 : i32
    %0 = arith.muli %arg1, %c8_i32 : i32
    %1 = tpu.assume_multiple %0, 8 : i32
    %c0_i32 = arith.constant 0 : i32
    %2 = arith.cmpi eq, %arg0, %c0_i32 : i32
    %3 = arith.extui %2 : i1 to i32
    %c0_i32_0 = arith.constant 0 : i32
    %4 = arith.cmpi ne, %3, %c0_i32_0 : i32
    scf.if %4 {
      %c0_44 = arith.constant 0 : index
      %c0_45 = arith.constant 0 : index
      %104 = vector.load %arg2[%c0_44, %c0_45] : memref<8x16xf32, #tpu.memory_space<vmem>>, vector<8x16xf32>
      %c0_46 = arith.constant 0 : index
      %c0_47 = arith.constant 0 : index
      %105 = vector.load %arg4[%c0_46, %c0_47] : memref<16x32xf32, #tpu.memory_space<vmem>>, vector<16x32xf32>
      %cst_48 = arith.constant dense<0.000000e+00> : vector<8x32xf32>
      %106 = tpu.matmul %104, %105, %cst_48 {dimension_numbers = #tpu.dot_dimension_numbers<[1], [0], [0], [1], [0, 0, 1, 1], [], []>} : vector<8x16xf32>, vector<16x32xf32>, vector<8x32xf32> -> vector<8x32xf32>
      %c0_49 = arith.constant 0 : index
      %c0_50 = arith.constant 0 : index
      %107 = vector.load %arg3[%c0_49, %c0_50] : memref<4x32xf32, #tpu.memory_space<vmem>>, vector<1x32xf32>
      %108 = vector.broadcast %107 : vector<1x32xf32> to vector<8x32xf32>
      %109 = arith.addf %106, %108 : vector<8x32xf32>
      %110 = arith.index_cast %1 : i32 to index
      %c0_51 = arith.constant 0 : index
      %111 = vector.load %arg12[%110, %c0_51] : memref<8x32xf32, #tpu.memory_space<vmem>>, vector<8x32xf32>
      tpu.vector_store %arg12[%110, %c0_51], %109 {strides = array<i32>} : memref<8x32xf32, #tpu.memory_space<vmem>>, vector<8x32xf32>,
    } else {
    }
    %5 = arith.index_cast %1 : i32 to index
    %c0 = arith.constant 0 : index
    %6 = vector.load %arg12[%5, %c0] : memref<8x32xf32, #tpu.memory_space<vmem>>, vector<8x32xf32>
    %c0_1 = arith.constant 0 : index
    %c0_2 = arith.constant 0 : index
    %c0_3 = arith.constant 0 : index
    %7 = vector.load %arg7[%c0_1, %c0_2, %c0_3] : memref<1x4x128xf32, #tpu.memory_space<vmem>>, vector<1x1x32xf32>
    %8 = vector.shape_cast %7 : vector<1x1x32xf32> to vector<1x32xf32>
    %c0_4 = arith.constant 0 : index
    %c0_5 = arith.constant 0 : index
    %c32 = arith.constant 32 : index
    %9 = vector.load %arg7[%c0_4, %c0_5, %c32] : memref<1x4x128xf32, #tpu.memory_space<vmem>>, vector<1x1x32xf32>
    %10 = vector.shape_cast %9 : vector<1x1x32xf32> to vector<1x32xf32>
    %cst = arith.constant dense<0.000000e+00> : vector<8xf32>
    %11 = vector.multi_reduction <add>, %6, %cst [1] : vector<8x32xf32> to vector<8xf32>
    %12 = vector.shape_cast %11 : vector<8xf32> to vector<8x1xf32>
    %cst_6 = arith.constant 3.200000e+01 : f32
    %13 = vector.broadcast %cst_6 : f32 to vector<8x1xf32>
    %14 = arith.divf %12, %13 : vector<8x1xf32>
    %15 = vector.broadcast %14 : vector<8x1xf32> to vector<8x32xf32>
    %16 = arith.subf %6, %15 : vector<8x32xf32>
    %17 = arith.mulf %16, %16 : vector<8x32xf32>
    %cst_7 = arith.constant dense<0.000000e+00> : vector<8xf32>
    %18 = vector.multi_reduction <add>, %17, %cst_7 [1] : vector<8x32xf32> to vector<8xf32>
    %19 = vector.shape_cast %18 : vector<8xf32> to vector<8x1xf32>
    %cst_8 = arith.constant 3.200000e+01 : f32
    %20 = vector.broadcast %cst_8 : f32 to vector<8x1xf32>
    %21 = arith.divf %19, %20 : vector<8x1xf32>
    %22 = vector.broadcast %14 : vector<8x1xf32> to vector<8x32xf32>
    %23 = arith.subf %6, %22 : vector<8x32xf32>
    %cst_9 = arith.constant 9.99999974E-6 : f32
    %24 = vector.broadcast %cst_9 : f32 to vector<8x1xf32>
    %25 = arith.addf %21, %24 : vector<8x1xf32>
    %26 = math.rsqrt %25 : vector<8x1xf32>
    %27 = vector.broadcast %26 : vector<8x1xf32> to vector<8x32xf32>
    %28 = arith.mulf %23, %27 : vector<8x32xf32>
    %29 = vector.broadcast %8 : vector<1x32xf32> to vector<8x32xf32>
    %30 = arith.mulf %28, %29 : vector<8x32xf32>
    %31 = vector.broadcast %10 : vector<1x32xf32> to vector<8x32xf32>
    %32 = arith.addf %30, %31 : vector<8x32xf32>
    %33 = arith.truncf %32 : vector<8x32xf32> to vector<8x32xbf16>
    %c0_10 = arith.constant 0 : index
    %c0_11 = arith.constant 0 : index
    %c0_12 = arith.constant 0 : index
    %34 = vector.load %arg8[%c0_10, %c0_11, %c0_12] : memref<1x32x32xbf16, #tpu.memory_space<vmem>>, vector<1x32x32xbf16>
    %35 = vector.shape_cast %34 : vector<1x32x32xbf16> to vector<32x32xbf16>
    %cst_13 = arith.constant dense<0.000000e+00> : vector<8x32xf32>
    %36 = tpu.matmul %33, %35, %cst_13 {dimension_numbers = #tpu.dot_dimension_numbers<[1], [0], [0], [1], [0, 0, 1, 1], [], []>} : vector<8x32xbf16>, vector<32x32xbf16>, vector<8x32xf32> -> vector<8x32xf32>
    %c0_14 = arith.constant 0 : index
    %c1 = arith.constant 1 : index
    %c0_15 = arith.constant 0 : index
    %37 = vector.load %arg7[%c0_14, %c1, %c0_15] : memref<1x4x128xf32, #tpu.memory_space<vmem>>, vector<1x1x32xf32>
    %38 = vector.shape_cast %37 : vector<1x1x32xf32> to vector<1x32xf32>
    %39 = vector.broadcast %38 : vector<1x32xf32> to vector<8x32xf32>
    %40 = arith.addf %36, %39 : vector<8x32xf32>
    %41 = arith.addf %6, %40 : vector<8x32xf32>
    %c0_16 = arith.constant 0 : index
    %c0_17 = arith.constant 0 : index
    %c64 = arith.constant 64 : index
    %42 = vector.load %arg7[%c0_16, %c0_17, %c64] : memref<1x4x128xf32, #tpu.memory_space<vmem>>, vector<1x1x32xf32>
    %43 = vector.shape_cast %42 : vector<1x1x32xf32> to vector<1x32xf32>
    %c0_18 = arith.constant 0 : index
    %c0_19 = arith.constant 0 : index
    %c96 = arith.constant 96 : index
    %44 = vector.load %arg7[%c0_18, %c0_19, %c96] : memref<1x4x128xf32, #tpu.memory_space<vmem>>, vector<1x1x32xf32>
    %45 = vector.shape_cast %44 : vector<1x1x32xf32> to vector<1x32xf32>
    %cst_20 = arith.constant dense<0.000000e+00> : vector<8xf32>
    %46 = vector.multi_reduction <add>, %41, %cst_20 [1] : vector<8x32xf32> to vector<8xf32>
    %47 = vector.shape_cast %46 : vector<8xf32> to vector<8x1xf32>
    %cst_21 = arith.constant 3.200000e+01 : f32
    %48 = vector.broadcast %cst_21 : f32 to vector<8x1xf32>
    %49 = arith.divf %47, %48 : vector<8x1xf32>
    %50 = vector.broadcast %49 : vector<8x1xf32> to vector<8x32xf32>
    %51 = arith.subf %41, %50 : vector<8x32xf32>
    %52 = arith.mulf %51, %51 : vector<8x32xf32>
    %cst_22 = arith.constant dense<0.000000e+00> : vector<8xf32>
    %53 = vector.multi_reduction <add>, %52, %cst_22 [1] : vector<8x32xf32> to vector<8xf32>
    %54 = vector.shape_cast %53 : vector<8xf32> to vector<8x1xf32>
    %cst_23 = arith.constant 3.200000e+01 : f32
    %55 = vector.broadcast %cst_23 : f32 to vector<8x1xf32>
    %56 = arith.divf %54, %55 : vector<8x1xf32>
    %57 = vector.broadcast %49 : vector<8x1xf32> to vector<8x32xf32>
    %58 = arith.subf %41, %57 : vector<8x32xf32>
    %cst_24 = arith.constant 9.99999974E-6 : f32
    %59 = vector.broadcast %cst_24 : f32 to vector<8x1xf32>
    %60 = arith.addf %56, %59 : vector<8x1xf32>
    %61 = math.rsqrt %60 : vector<8x1xf32>
    %62 = vector.broadcast %61 : vector<8x1xf32> to vector<8x32xf32>
    %63 = arith.mulf %58, %62 : vector<8x32xf32>
    %64 = vector.broadcast %43 : vector<1x32xf32> to vector<8x32xf32>
    %65 = arith.mulf %63, %64 : vector<8x32xf32>
    %66 = vector.broadcast %45 : vector<1x32xf32> to vector<8x32xf32>
    %67 = arith.addf %65, %66 : vector<8x32xf32>
    %68 = arith.truncf %67 : vector<8x32xf32> to vector<8x32xbf16>
    %c0_25 = arith.constant 0 : index
    %c0_26 = arith.constant 0 : index
    %c0_27 = arith.constant 0 : index
    %69 = vector.load %arg9[%c0_25, %c0_26, %c0_27] : memref<1x32x128xbf16, #tpu.memory_space<vmem>>, vector<1x32x128xbf16>
    %70 = vector.shape_cast %69 : vector<1x32x128xbf16> to vector<32x128xbf16>
    %cst_28 = arith.constant dense<0.000000e+00> : vector<8x128xf32>
    %71 = tpu.matmul %68, %70, %cst_28 {dimension_numbers = #tpu.dot_dimension_numbers<[1], [0], [0], [1], [0, 0, 1, 1], [], []>} : vector<8x32xbf16>, vector<32x128xbf16>, vector<8x128xf32> -> vector<8x128xf32>
    %c0_29 = arith.constant 0 : index
    %c2 = arith.constant 2 : index
    %c0_30 = arith.constant 0 : index
    %72 = vector.load %arg7[%c0_29, %c2, %c0_30] : memref<1x4x128xf32, #tpu.memory_space<vmem>>, vector<1x1x128xf32>
    %73 = vector.shape_cast %72 : vector<1x1x128xf32> to vector<1x128xf32>
    %74 = vector.broadcast %73 : vector<1x128xf32> to vector<8x128xf32>
    %75 = arith.addf %71, %74 : vector<8x128xf32>
    %cst_31 = arith.constant 0.636619746 : f32
    %76 = math.sqrt %cst_31 : f32
    %cst_32 = arith.constant 5.000000e-01 : f32
    %77 = vector.broadcast %cst_32 : f32 to vector<8x128xf32>
    %78 = arith.mulf %77, %75 : vector<8x128xf32>
    %cst_33 = arith.constant 4.471500e-02 : f32
    %79 = vector.broadcast %cst_33 : f32 to vector<8x128xf32>
    %80 = arith.mulf %79, %75 : vector<8x128xf32>
    %81 = arith.mulf %80, %75 : vector<8x128xf32>
    %82 = arith.mulf %81, %75 : vector<8x128xf32>
    %83 = arith.addf %75, %82 : vector<8x128xf32>
    %84 = vector.broadcast %76 : f32 to vector<8x128xf32>
    %85 = arith.mulf %84, %83 : vector<8x128xf32>
    %86 = math.tanh %85 : vector<8x128xf32>
    %cst_34 = arith.constant 1.000000e+00 : f32
    %87 = vector.broadcast %cst_34 : f32 to vector<8x128xf32>
    %88 = arith.addf %87, %86 : vector<8x128xf32>
    %89 = arith.mulf %78, %88 : vector<8x128xf32>
    %90 = arith.truncf %89 : vector<8x128xf32> to vector<8x128xbf16>
    %c0_35 = arith.constant 0 : index
    %c0_36 = arith.constant 0 : index
    %c0_37 = arith.constant 0 : index
    %91 = vector.load %arg10[%c0_35, %c0_36, %c0_37] : memref<1x128x32xbf16, #tpu.memory_space<vmem>>, vector<1x128x32xbf16>
    %92 = vector.shape_cast %91 : vector<1x128x32xbf16> to vector<128x32xbf16>
    %cst_38 = arith.constant dense<0.000000e+00> : vector<8x32xf32>
    %93 = tpu.matmul %90, %92, %cst_38 {dimension_numbers = #tpu.dot_dimension_numbers<[1], [0], [0], [1], [0, 0, 1, 1], [], []>} : vector<8x128xbf16>, vector<128x32xbf16>, vector<8x32xf32> -> vector<8x32xf32>
    %c0_39 = arith.constant 0 : index
    %c1_40 = arith.constant 1 : index
    %c32_41 = arith.constant 32 : index
    %94 = vector.load %arg7[%c0_39, %c1_40, %c32_41] : memref<1x4x128xf32, #tpu.memory_space<vmem>>, vector<1x1x32xf32>
    %95 = vector.shape_cast %94 : vector<1x1x32xf32> to vector<1x32xf32>
    %96 = vector.broadcast %95 : vector<1x32xf32> to vector<8x32xf32>
    %97 = arith.addf %93, %96 : vector<8x32xf32>
    %98 = arith.addf %41, %97 : vector<8x32xf32>
    %99 = arith.index_cast %1 : i32 to index
    %c0_42 = arith.constant 0 : index
    %100 = vector.load %arg12[%99, %c0_42] : memref<8x32xf32, #tpu.memory_space<vmem>>, vector<8x32xf32>
    tpu.vector_store %arg12[%99, %c0_42], %98 {strides = array<i32>} : memref<8x32xf32, #tpu.memory_space<vmem>>, vector<8x32xf32>,
    %c3_i32 = arith.constant 3 : i32
    %101 = arith.cmpi eq, %arg0, %c3_i32 : i32
    %102 = arith.extui %101 : i1 to i32
    %c0_i32_43 = arith.constant 0 : i32
    %103 = arith.cmpi ne, %102, %c0_i32_43 : i32
    scf.if %103 {
      %c1_44 = arith.constant 1 : index
      %c0_45 = arith.constant 0 : index
      %104 = vector.load %arg3[%c1_44, %c0_45] : memref<4x32xf32, #tpu.memory_space<vmem>>, vector<1x32xf32>
      %c2_46 = arith.constant 2 : index
      %c0_47 = arith.constant 0 : index
      %105 = vector.load %arg3[%c2_46, %c0_47] : memref<4x32xf32, #tpu.memory_space<vmem>>, vector<1x32xf32>
      %cst_48 = arith.constant dense<0.000000e+00> : vector<8xf32>
      %106 = vector.multi_reduction <add>, %98, %cst_48 [1] : vector<8x32xf32> to vector<8xf32>
      %107 = vector.shape_cast %106 : vector<8xf32> to vector<8x1xf32>
      %cst_49 = arith.constant 3.200000e+01 : f32
      %108 = vector.broadcast %cst_49 : f32 to vector<8x1xf32>
      %109 = arith.divf %107, %108 : vector<8x1xf32>
      %110 = vector.broadcast %109 : vector<8x1xf32> to vector<8x32xf32>
      %111 = arith.subf %98, %110 : vector<8x32xf32>
      %112 = arith.mulf %111, %111 : vector<8x32xf32>
      %cst_50 = arith.constant dense<0.000000e+00> : vector<8xf32>
      %113 = vector.multi_reduction <add>, %112, %cst_50 [1] : vector<8x32xf32> to vector<8xf32>
      %114 = vector.shape_cast %113 : vector<8xf32> to vector<8x1xf32>
      %cst_51 = arith.constant 3.200000e+01 : f32
      %115 = vector.broadcast %cst_51 : f32 to vector<8x1xf32>
      %116 = arith.divf %114, %115 : vector<8x1xf32>
      %117 = vector.broadcast %109 : vector<8x1xf32> to vector<8x32xf32>
      %118 = arith.subf %98, %117 : vector<8x32xf32>
      %cst_52 = arith.constant 9.99999974E-6 : f32
      %119 = vector.broadcast %cst_52 : f32 to vector<8x1xf32>
      %120 = arith.addf %116, %119 : vector<8x1xf32>
      %121 = math.rsqrt %120 : vector<8x1xf32>
      %122 = vector.broadcast %121 : vector<8x1xf32> to vector<8x32xf32>
      %123 = arith.mulf %118, %122 : vector<8x32xf32>
      %124 = vector.broadcast %104 : vector<1x32xf32> to vector<8x32xf32>
      %125 = arith.mulf %123, %124 : vector<8x32xf32>
      %126 = vector.broadcast %105 : vector<1x32xf32> to vector<8x32xf32>
      %127 = arith.addf %125, %126 : vector<8x32xf32>
      %c0_53 = arith.constant 0 : index
      %c0_54 = arith.constant 0 : index
      %128 = vector.load %arg5[%c0_53, %c0_54] : memref<32x128xf32, #tpu.memory_space<vmem>>, vector<32x128xf32>
      %cst_55 = arith.constant dense<0.000000e+00> : vector<8x128xf32>
      %129 = tpu.matmul %127, %128, %cst_55 {dimension_numbers = #tpu.dot_dimension_numbers<[1], [0], [0], [1], [0, 0, 1, 1], [], []>} : vector<8x32xf32>, vector<32x128xf32>, vector<8x128xf32> -> vector<8x128xf32>
      %c0_56 = arith.constant 0 : index
      %c0_57 = arith.constant 0 : index
      %130 = vector.load %arg6[%c0_56, %c0_57] : memref<1x128xf32, #tpu.memory_space<vmem>>, vector<1x128xf32>
      %131 = vector.broadcast %130 : vector<1x128xf32> to vector<8x128xf32>
      %132 = arith.addf %129, %131 : vector<8x128xf32>
      %c0_58 = arith.constant 0 : index
      %c0_59 = arith.constant 0 : index
      %133 = vector.load %arg11[%c0_58, %c0_59] : memref<8x128xf32, #tpu.memory_space<vmem>>, vector<8x128xf32>
      tpu.vector_store %arg11[%c0_58, %c0_59], %132 {strides = array<i32>} : memref<8x128xf32, #tpu.memory_space<vmem>>, vector<8x128xf32>,
    } else {
    }
    return
  }
  func.func @transform_0(%arg0: i32, %arg1: i32) -> (i32, i32) {
    %c0_i32 = arith.constant 0 : i32
    %c0_i32_0 = arith.constant 0 : i32
    return %arg1, %c0_i32 : i32, i32
  }
  func.func @transform_1(%arg0: i32, %arg1: i32) -> (i32, i32) {
    %c0_i32 = arith.constant 0 : i32
    %c0_i32_0 = arith.constant 0 : i32
    %c0_i32_1 = arith.constant 0 : i32
    return %c0_i32, %c0_i32_0 : i32, i32
  }
  func.func @transform_2(%arg0: i32, %arg1: i32) -> (i32, i32) {
    %c0_i32 = arith.constant 0 : i32
    %c0_i32_0 = arith.constant 0 : i32
    %c0_i32_1 = arith.constant 0 : i32
    return %c0_i32, %c0_i32_0 : i32, i32
  }
  func.func @transform_3(%arg0: i32, %arg1: i32) -> (i32, i32) {
    %c0_i32 = arith.constant 0 : i32
    %c0_i32_0 = arith.constant 0 : i32
    %c0_i32_1 = arith.constant 0 : i32
    return %c0_i32, %c0_i32_0 : i32, i32
  }
  func.func @transform_4(%arg0: i32, %arg1: i32) -> (i32, i32) {
    %c0_i32 = arith.constant 0 : i32
    %c0_i32_0 = arith.constant 0 : i32
    %c0_i32_1 = arith.constant 0 : i32
    return %c0_i32, %c0_i32_0 : i32, i32
  }
  func.func @transform_5(%arg0: i32, %arg1: i32) -> (i32, i32, i32) {
    %c0_i32 = arith.constant 0 : i32
    %c0_i32_0 = arith.constant 0 : i32
    %c0_i32_1 = arith.constant 0 : i32
    return %arg0, %c0_i32, %c0_i32_0 : i32, i32, i32
  }
  func.func @transform_6(%arg0: i32, %arg1: i32) -> (i32, i32, i32) {
    %c0_i32 = arith.constant 0 : i32
    %c0_i32_0 = arith.constant 0 : i32
    %c0_i32_1 = arith.constant 0 : i32
    return %arg0, %c0_i32, %c0_i32_0 : i32, i32, i32
  }
  func.func @transform_7(%arg0: i32, %arg1: i32) -> (i32, i32, i32) {
    %c0_i32 = arith.constant 0 : i32
    %c0_i32_0 = arith.constant 0 : i32
    %c0_i32_1 = arith.constant 0 : i32
    return %arg0, %c0_i32, %c0_i32_0 : i32, i32, i32
  }
  func.func @transform_8(%arg0: i32, %arg1: i32) -> (i32, i32, i32) {
    %c0_i32 = arith.constant 0 : i32
    %c0_i32_0 = arith.constant 0 : i32
    %c0_i32_1 = arith.constant 0 : i32
    return %arg0, %c0_i32, %c0_i32_0 : i32, i32, i32
  }
  func.func @transform_9(%arg0: i32, %arg1: i32) -> (i32, i32) {
    %c0_i32 = arith.constant 0 : i32
    %c0_i32_0 = arith.constant 0 : i32
    return %arg1, %c0_i32 : i32, i32
  }
}

</mosaic_0001>

<bundles_post_ra>
// kernel: tpu_custom_call.1
= control target key start
LH: loop header
LB: loop body
LE: loop exit
PB: predicated region body
PF: predicated region fallthrough
CT: control target
= control target key end

     0   :  { %14 = vsyncpa [#allocation4], 0  ;;  %s1322_s30 = smov 0   ;;  %s1324_s10 = smov 0   ;;  %s1473_s0 = inlined_call_operand.vmem [shape: f32[8,16], index: 0, kind: input, shape index: {}]   ;;  %s1474_s1 = inlined_call_operand.vmem [shape: f32[4,32], index: 1, kind: input, shape index: {}]   ;;  %s1475_s2 = inlined_call_operand.vmem [shape: f32[16,32], index: 2, kind: input, shape index: {}]   ;;  %s1476_s3 = inlined_call_operand.vmem [shape: f32[32,128], index: 3, kind: input, shape index: {}]   ;;  %s1477_s4 = inlined_call_operand.vmem [shape: f32[1,128], index: 4, kind: input, shape index: {}]   ;;  %s1478_s5 = inlined_call_operand.vmem [shape: f32[4,4,128], index: 5, kind: input, shape index: {}]   ;;  %s1479_s6 = inlined_call_operand.vmem [shape: bf16[4,32,32], index: 6, kind: input, shape index: {}]   ;;  %s1480_s7 = inlined_call_operand.vmem [shape: bf16[4,32,128], index: 7, kind: input, shape index: {}]   ;;  %s1481_s8 = inlined_call_operand.vmem [shape: bf16[4,128,32], index: 8, kind: input, shape index: {}]   ;;  %s1482_s9 = inlined_call_operand.hbm [shape: f32[8,128], index: 9, kind: output, shape index: {}]  }
   0x1   :  { %s1326_s11 = smov 0  }
   0x2 LB: > { %s1029_s12 = sadd.s32 4294967295, %s1260_s11   ;;  %s32_s13 = sadd.s32 1, %s1256_s10  ;;  %s1260_s11 = sphi %s1326_s11, %s20_s11   ;;  %s1256_s10 = sphi %s1324_s10, %s1485_s10   ;;  %s1252_s30 = sphi %s1322_s30, %s1484_s30  }
   0x3   : > { %p34_p0 = scmp.ge.s32.totalorder %s32_s13, 4  ;;  %p1033_p1 = scmp.ge.s32.totalorder %s1260_s11, 1 }
   0x4   : > { %p338_p2 = scmp.lt.s32.totalorder %s1260_s11, 5 }
   0x5   : > { %s1487_s13 = smov (%p34_p0, %s32_s13), 0 }
   0x6   : > { %p339_p3 = pnand %p1033_p1, %p338_p2 }
   0x7   : > { %p391_p4 = scmp.lt.s32.totalorder (!%p339_p3), %s1252_s30, 3  ;;  %p1041_p5 = scmp.ne.s32.totalorder (!%p339_p3), %s1252_s30, 0 }
   0x8   : > { %342 = sbr.rel (%p339_p3) target bundleno = 1987 (0x7c3), region = 56 }
   0xd   : > { %s392_s14 = scalar_select %p391_p4, %s1252_s30, 3 }
   0xe   : > { %415 = sbr.rel (%p1041_p5) target bundleno = 220 (0xdc), region = 60 }
   0xf   : > { %s1034_s15 = sshll.u32 %s392_s14, 2  ;;  %s1070_s16 = sshll.u32 %s392_s14, 4 }
  0x10   : > { %s1348_s19 = scalar_lea.vmem %s1478_s5, %s1034_s15  ;;  %s1353_s22 = scalar_lea.vmem %s1479_s6, %s1070_s16 }
  0x11   : > { %s1358_s25 = scalar_lea.vmem %s1480_s7, %s1070_s16  ;;  %s1072_s26 = sshll.u32 %s392_s14, 6 }
  0x12   : > { %s1363_s29 = scalar_lea.vmem %s1481_s8, %s1072_s26 }
  0x13   : > { %v418_v0 = vld [vmem:[%s1475_s2 + $0x8] sm:$0xff]  ;;  %v1262_v1 = vmov 0.0   ;;  %v417_v2 = vld [vmem:[%s1475_s2] sm:$0xff]  ;;  %vm1263_vm0 = vmmov 0   ;;  %vm424_vm1 = vcmask 130048   ;;  %vm499_vm2 = vcmask 261120  }
  0x14   : > { %1096 = vmatprep.subr.mxu0 %v1262_v1  ;;  %1100 = vmatprep.mubr.msk.f32.mxu0 %vm1263_vm0, %v1262_v1  ;;  %v416_v3 = vld [vmem:[%s1473_s0] sm:$0xff] }
  0x15   : > { %1097 = vmatpush3.msra.mxu0 %v418_v0  ;;  %v1042_v4 = vld [vmem:[%s1474_s1] ss:$0 sm:$0xff] }
  0x16   : > { %1098 = vmatprep.subr.mxu0 %v1262_v1 }
  0x17   : > { %1099 = vmatpush3.msra.mxu0 %v417_v2 }
  0x18   : > { %1101 = vmatmul.mubr.msk.f32.vlgmr.msra.gmra.mxu0 %vm424_vm1, %v416_v3 }
  0xd8   : > { %v494_v5 = vpop.f32.mrf.mxu0 }
  0xd9   : > { %v495_v6 = vadd.f32 %v1042_v4, %v494_v5 }
  0xda   : > { %v1102_v7 = vpop.f32.mrf.mxu0 }
  0xdb   : > { %500 = vst.msk [vmem:[#allocation2] sm:$0xff] %vm499_vm2, %v495_v6 }
  0xdc PF: > { %vm504_vm3 = vcmask 261120   ;;  %v1044_v10 = vld [vmem:[%s1348_s19] ss:$0 sm:$0xff]  ;;  %s1264_s24 = smov 96   ;;  %v1190_v16 = vld [vmem:[%s1353_s22 + $0x8] sm:$0xff]   ;;  %v1265_v17 = vmov 0.0  }
  0xdd   : > { %525 = vrot.lane.b32.xlu1 %v1044_v10, %s1264_s24  ;;  %1103 = vmatprep.subr.bf16.mxu1 %v1265_v17  ;;  %v1191_v18 = vld [vmem:[%s1353_s22] sm:$0xff]   ;;  %vm1266_vm4 = vmmov 0   ;;  %s1267_s22 = smov 64   ;;  %s1268_s26 = smov 32   ;;  %v1192_v41 = vld [vmem:[%s1358_s25 + $0x8] sm:$0xff]   ;;  %v1194_v53 = vld [vmem:[%s1363_s29 + $0x38] sm:$0xff]  }
  0xde   : > { %1119 = vmatprep.subr.bf16.mxu0 %v1265_v17  ;;  %1104 = vmatpush3.bf16.msra.mxu1 %v1190_v16  ;;  %v1045_v28 = vld [vmem:[%s1348_s19 + $0x1] ss:$0 sm:$0xff]  ;;  %v1195_v54 = vld [vmem:[%s1363_s29 + $0x30] sm:$0xff]   ;;  %v1196_v55 = vld [vmem:[%s1363_s29 + $0x28] sm:$0xff]   ;;  %p1061_p6 = scmp.ne.s32.totalorder %s1252_s30, 3 }
  0xdf   : > { %1105 = vmatprep.subr.bf16.mxu1 %v1265_v17  ;;  %1107 = vmatprep.mubr.msk.bf16.mxu1 %vm1266_vm4, %v1265_v17  ;;  %v1193_v42 = vld [vmem:[%s1358_s25] sm:$0xff]   ;;  %v1198_v57 = vld [vmem:[%s1363_s29 + $0x18] sm:$0xff]   ;;  %v1199_v58 = vld [vmem:[%s1363_s29 + $0x10] sm:$0xff]  }
  0xe0   : > { %1135 = vmatprep.mubr.msk.bf16.mxu0 %vm1266_vm4, %v1265_v17  ;;  %1120 = vmatpush3.bf16.msra.mxu0 %v1194_v53  ;;  %v1197_v56 = vld [vmem:[%s1363_s29 + $0x20] sm:$0xff]   ;;  %v1200_v59 = vld [vmem:[%s1363_s29 + $0x8] sm:$0xff]  }
  0xe1   : > { %1121 = vmatprep.subr.bf16.mxu0 %v1265_v17  ;;  %v1201_v60 = vld [vmem:[%s1363_s29] sm:$0xff]  }
  0xe2   : > { %v502_v8 = vld [vmem:[#allocation2] sm:$0xff]  ;;  %1106 = vmatpush3.bf16.msra.mxu1 %v1191_v18 }
  0xe3   : > { %v505_v9 = vsel %vm504_vm3, %v502_v8, 0.0  ;;  %1111 = vmatprep.subr.bf16.mxu1 %v1265_v17  ;;  %v1049_v61 = vld [vmem:[%s1348_s19 + $0x2] ss:$0 sm:$0xff] }
  0xe4   : > { %506 = vadd.xlane.f32.xlu0 %v505_v9  ;;  %1122 = vmatpush3.bf16.msra.mxu0 %v1195_v54 }
  0xe5   : > { %1123 = vmatprep.subr.bf16.mxu0 %v1265_v17 }
  0xe8   : > { %1124 = vmatpush3.bf16.msra.mxu0 %v1196_v55 }
  0xe9   : > { %1125 = vmatprep.subr.bf16.mxu0 %v1265_v17 }
  0xec   : > { %1126 = vmatpush3.bf16.msra.mxu0 %v1197_v56 }
  0xed   : > { %1127 = vmatprep.subr.bf16.mxu0 %v1265_v17 }
  0xf0   : > { %1128 = vmatpush3.bf16.msra.mxu0 %v1198_v57 }
  0xf1   : > { %1129 = vmatprep.subr.bf16.mxu0 %v1265_v17 }
  0xf4   : > { %1130 = vmatpush3.bf16.msra.mxu0 %v1199_v58 }
  0xf5   : > { %1131 = vmatprep.subr.bf16.mxu0 %v1265_v17 }
  0xf8   : > { %1132 = vmatpush3.bf16.msra.mxu0 %v1200_v59 }
  0xf9   : > { %1133 = vmatprep.subr.bf16.mxu0 %v1265_v17 }
  0xfc   : > { %1134 = vmatpush3.bf16.msra.mxu0 %v1201_v60 }
 0x14f   : > { %v526_v24 = vpop.permute.xlu1 %525 }
 0x16d   : > { %v507_v11 = vpop.xlane.xlu0 %506 }
 0x16e   : > { %v509_v12 = vmul.f32 0.03125, %v507_v11 }
 0x170   : > { %v510_v13 = vsub.f32 %v502_v8, %v509_v12 }
 0x172   : > { %v511_v14 = vmul.f32 %v510_v13, %v510_v13 }
 0x174   : > { %v512_v15 = vsel %vm504_vm3, %v511_v14, 0.0 }
 0x175   : > { %513 = vadd.xlane.f32.xlu0 %v512_v15 }
 0x1fe   : > { %v514_v19 = vpop.xlane.xlu0 %513 }
 0x1ff   : > { %v515_v20 = vmul.f32 0.03125, %v514_v19 }
 0x201   : > { %v516_v21 = vadd.f32 1e-05, %v515_v20 }
 0x203   : > { %1202 = vrsqrt.f32 %v516_v21 }
 0x210   : > { %v1203_v22 = vpop.eup %1202 }
 0x211   : > { %v518_v23 = vmul.f32 %v1203_v22, %v510_v13 }
 0x213   : > { %v523_v25 = vmul.f32 %v1044_v10, %v518_v23 }
 0x215   : > { %v528_v26 = vadd.f32 %v526_v24, %v523_v25 }
 0x217   : > { %v529_v27 = vpack.c.bf16 %v528_v26, %v528_v26 }
 0x219   : > { %1108 = vmatmul.mubr.msk.bf16.vlgmr.msra.gmra.mxu1 %vm504_vm3, %v529_v27 }
 0x21a   : > { %1115 = vmatprep.mubr.msk.bf16.mxu1 %vm1266_vm4, %v1265_v17  ;;  %1112 = vmatpush3.bf16.msra.mxu1 %v1192_v41 }
 0x21b   : > { %1113 = vmatprep.subr.bf16.mxu1 %v1265_v17 }
 0x21e   : > { %1114 = vmatpush3.bf16.msra.mxu1 %v1193_v42 }
 0x2d9   : > { %v588_v29 = vpop.f32.mrf.mxu1 }
 0x2da   : > { %v589_v30 = vadd.f32 %v1045_v28, %v588_v29 }
 0x2db   : > { %v1109_v31 = vpop.f32.mrf.mxu1 }
 0x2dc   : > { %v1393_v32 = vadd.f32 %v589_v30, %v502_v8 }
 0x2dd   : > { %v591_v33 = vpop.f32.mrf.mxu1 }
 0x2de   : > { %v595_v34 = vsel %vm504_vm3, %v1393_v32, 0.0 }
 0x2df   : > { %596 = vadd.xlane.f32.xlu1 %v595_v34  ;;  %v1110_v35 = vpop.f32.mrf.mxu1 }
 0x368   : > { %v597_v36 = vpop.xlane.xlu1 %596 }
 0x369   : > { %v598_v37 = vmul.f32 0.03125, %v597_v36 }
 0x36b   : > { %v599_v38 = vsub.f32 %v1393_v32, %v598_v37 }
 0x36d   : > { %v600_v39 = vmul.f32 %v599_v38, %v599_v38 }
 0x36f   : > { %v601_v40 = vsel %vm504_vm3, %v600_v39, 0.0 }
 0x370   : > { %602 = vadd.xlane.f32.xlu0 %v601_v40 }
 0x386   : > { %608 = vrot.lane.b32.xlu0 %v1044_v10, %s1267_s22 }
 0x38a   : > { %612 = vrot.lane.b32.xlu0 %v1044_v10, %s1268_s26 }
 0x38e   : > { %756 = vrot.lane.b32.xlu0 %v1045_v28, %s1264_s24 }
 0x3f9   : > { %v603_v43 = vpop.xlane.xlu0 %602 }
 0x3fa   : > { %v604_v44 = vmul.f32 0.03125, %v603_v43 }
 0x3fc   : > { %v605_v45 = vadd.f32 1e-05, %v604_v44 }
 0x3fd   : > { %v609_v46 = vpop.permute.xlu0 %608 }
 0x3fe   : > { %1204 = vrsqrt.f32 %v605_v45 }
 0x401   : > { %v613_v49 = vpop.permute.xlu0 %612 }
 0x405   : > { %v757_v13 = vpop.permute.xlu0 %756 }
 0x40b   : > { %v1205_v47 = vpop.eup %1204 }
 0x40c   : > { %v607_v48 = vmul.f32 %v1205_v47, %v599_v38 }
 0x40e   : > { %v611_v50 = vmul.f32 %v609_v46, %v607_v48 }
 0x410   : > { %v615_v51 = vadd.f32 %v613_v49, %v611_v50 }
 0x412   : > { %v616_v52 = vpack.c.bf16 %v615_v51, %v615_v51 }
 0x414   : > { %1116 = vmatmul.mubr.msk.bf16.vlgmr.msra.gmra.mxu1 %vm504_vm3, %v616_v52 }
 0x4d4   : > { %v675_v62 = vpop.f32.mrf.mxu1 }
 0x4d5   : > { %v676_v63 = vadd.f32 %v1049_v61, %v675_v62 }
 0x4d6   : > { %v1117_v0 = vpop.f32.mrf.mxu1 }
 0x4d7   : > { %v682_v1 = vmul.f32 0.044715, %v676_v63  ;;  %v681_v9 = vmul.f32 0.5, %v676_v63 }
 0x4d8   : > { %v678_v2 = vpop.f32.mrf.mxu1 }
 0x4d9   : > { %v683_v3 = vmul.f32 %v682_v1, %v676_v63 }
 0x4da   : > { %v1118_v4 = vpop.f32.mrf.mxu1 }
 0x4db   : > { %v684_v5 = vmul.f32 %v683_v3, %v676_v63 }
 0x4dd   : > { %v685_v6 = vadd.f32 %v684_v5, %v676_v63 }
 0x4df   : > { %v686_v7 = vmul.f32 0.7978845, %v685_v6 }
 0x4e1   : > { %1206 = vtanh.f32 %v686_v7 }
 0x4ee   : > { %v1207_v8 = vpop.eup %1206 }
 0x4ef   : > { %v688_v10 = vadd.f32 1.0, %v1207_v8 }
 0x4f1   : > { %v689_v11 = vmul.f32 %v688_v10, %v681_v9 }
 0x4f3   : > { %v690_v12 = vpack.c.bf16 %v689_v11, %v689_v11 }
 0x4f5   : > { %1136 = vmatmul.mubr.bf16.vlgmr.msra.gmra.mxu0 %v690_v12 }
 0x5b5   : > { %v793_v14 = vpop.f32.mrf.mxu0 }
 0x5b6   : > { %v794_v15 = vadd.f32 %v793_v14, %v757_v13 }
 0x5b7   : > { %v1137_v16 = vpop.f32.mrf.mxu0  ;;  %804 = sbr.rel (%p1061_p6) target bundleno = 1972 (0x7b4), region = 64 }
 0x5b8   : > { %v799_v17 = vadd.f32 %v794_v15, %v1393_v32 }
 0x5b9   : > { %v796_v18 = vpop.f32.mrf.mxu0 }
 0x5ba   : > { %800 = vst.msk [vmem:[#allocation2] sm:$0xff] %vm504_vm3, %v799_v17 }
 0x5bb   : > { %v1138_v19 = vpop.f32.mrf.mxu0 }
 0x5bc   : > { %v807_v20 = vsel %vm504_vm3, %v799_v17, 0.0  ;;  %v833_v26 = vld [vmem:[%s1476_s3 + $0x18] sm:$0xff]  ;;  %v1269_v27 = vmov 0.0   ;;  %v832_v28 = vld [vmem:[%s1476_s3 + $0x10] sm:$0xff]  ;;  %vm1270_vm5 = vmmov 0   ;;  %v831_v29 = vld [vmem:[%s1476_s3 + $0x8] sm:$0xff] }
 0x5bd   : > { %808 = vadd.xlane.f32.xlu0 %v807_v20  ;;  %1139 = vmatprep.subr.mxu0 %v1269_v27  ;;  %v830_v30 = vld [vmem:[%s1476_s3] sm:$0xff] }
 0x5be   : > { %1147 = vmatprep.mubr.msk.f32.mxu0 %vm1270_vm5, %v1269_v27  ;;  %1140 = vmatpush3.msra.mxu0 %v833_v26  ;;  %v1062_v35 = vld [vmem:[%s1474_s1 + $0x1] ss:$0 sm:$0xff]  ;;  %v1063_v37 = vld [vmem:[%s1474_s1 + $0x2] ss:$0 sm:$0xff]  ;;  %v1064_v40 = vld [vmem:[%s1477_s4] ss:$0 sm:$0xff] }
 0x5bf   : > { %1141 = vmatprep.subr.mxu0 %v1269_v27 }
 0x5c0   : > { %1142 = vmatpush3.msra.mxu0 %v832_v28 }
 0x5c1   : > { %1143 = vmatprep.subr.mxu0 %v1269_v27 }
 0x5c2   : > { %1144 = vmatpush3.msra.mxu0 %v831_v29 }
 0x5c3   : > { %1145 = vmatprep.subr.mxu0 %v1269_v27 }
 0x5c4   : > { %1146 = vmatpush3.msra.mxu0 %v830_v30 }
 0x646   : > { %v809_v21 = vpop.xlane.xlu0 %808 }
 0x647   : > { %v810_v22 = vmul.f32 0.03125, %v809_v21 }
 0x649   : > { %v811_v23 = vsub.f32 %v799_v17, %v810_v22 }
 0x64b   : > { %v812_v24 = vmul.f32 %v811_v23, %v811_v23 }
 0x64d   : > { %v813_v25 = vsel %vm504_vm3, %v812_v24, 0.0 }
 0x64e   : > { %814 = vadd.xlane.f32.xlu0 %v813_v25 }
 0x6d7   : > { %v815_v31 = vpop.xlane.xlu0 %814 }
 0x6d8   : > { %v816_v32 = vmul.f32 0.03125, %v815_v31 }
 0x6da   : > { %v817_v33 = vadd.f32 1e-05, %v816_v32 }
 0x6dc   : > { %1208 = vrsqrt.f32 %v817_v33 }
 0x6e9   : > { %v1209_v34 = vpop.eup %1208 }
 0x6ea   : > { %v819_v36 = vmul.f32 %v1209_v34, %v811_v23 }
 0x6ec   : > { %v824_v38 = vmul.f32 %v1062_v35, %v819_v36 }
 0x6ee   : > { %v829_v39 = vadd.f32 %v1063_v37, %v824_v38 }
 0x6f0   : > { %1148 = vmatmul.mubr.msk.f32.vlgmr.msra.gmra.mxu0 %vm504_vm3, %v829_v39 }
 0x7b0   : > { %v910_v41 = vpop.f32.mrf.mxu0 }
 0x7b1   : > { %v911_v42 = vadd.f32 %v1064_v40, %v910_v41 }
 0x7b2   : > { %v1149_v43 = vpop.f32.mrf.mxu0 }
 0x7b3   : > { %914 = vst [vmem:[#allocation3] sm:$0xff] %v911_v42 }
 0x7b4 PF: > { %p1449_p7 = scmp.eq.s32.totalorder %s1029_s12, 3  ;;  %s1271_s22 = smov [#allocation3]  }
 0x7b5   : > { %s924_s26 = sshll.u32 %s1271_s22, 4  ;;  %s925_s26 = int_to_ptr.vmem [resolvable:$true] %s924_s26 }
 0x7b6   : > { %s1210_s19 = scalar_lea.vmem %s925_s26, 128  ;;  %p1217_p11 = scmp.lt.s32.totalorder %s925_s26, %s925_s26 }
 0x7b7   : > { %p1211_p8 = scmp.ne.s32.totalorder %s925_s26, %s1210_s19  ;;  %p1218_p12 = scmp.lt.s32.totalorder %s1210_s19, %s1210_s19 }
 0x7b9   : > { %p1212_p9 = pnand %p1211_p8, %p1449_p7  ;;  %p1219_p13 = por %p1218_p12, %p1217_p11 }
 0x7bb   : > { %p1213_p10 = pneg %p1212_p9 }
 0x7bd   : > { %p1220_p0 = pnand %p1219_p13, %p1213_p10 }
 0x7bf   : > { %1223 = shalt.err (!%p1220_p0)
}
 0x7c0   : > { %1151 = dma.vmem_to_hbm [thread:$0]  (%p1449_p7), %s925_s26, 128, %s1482_s9, [#allocation4]  }
 0x7c1   : > { %1247 = dma.done.wait (%p1449_p7), [#allocation4], 128  }
 0x7c2   : > { %1249 = vsyncadd (%p1449_p7), [#allocation4], 4294967168 }
 0x7c3 PF: > { %s20_s11 = sadd.s32 1, %s1260_s11   ;;  %s1484_s30 = smov %s1256_s10 }
 0x7c4   : > { %p17_p1 = scmp.ge.s32.totalorder %s20_s11, 6   ;;  %s1485_s10 = smov %s1487_s13 }
 0x7c6   :  { %19 = sbr.rel (!%p17_p1) target bundleno = 2 (0x2), region = 106 }
 0x7cb   :  { %937 = vsyncpa [#allocation4], 1 }
 0x7cc   :  { %939 = vsyncpa [#allocation4 + $0x1], 1 }

</bundles_post_ra>
